<compile_context>
chip_gen: v5e
topology: v5e:2x2
jax: 0.10.0
libtpu: 0.0.40
codegen_flags: <defaults>
</compile_context>

<pallas_src>
import functools

import jax
import jax.numpy as jnp
from jax import lax
from jax.experimental import pallas as pl
from jax.experimental.pallas import tpu as pltpu


def _gumbel_topk_attn_kernel(feats_ref, hb_ref, wv_ref, wa_ref,
                             att_ref, alpha_ref, *, topk):
    """Processes a (Bt, N, F) batch tile per grid step.

    feats_ref : (Bt, N, F)  native dtype (f32 or bf16)
    hb_ref    : (Bt, 1, A)  precomputed wh(key) + bh + bv   (f32)
    wv_ref    : (F, A)      f32
    wa_ref    : (1, 1, A)   f32
    att_ref   : (Bt, F)     f32, lane-dense
    alpha_ref : (Bt, N)     f32, lane-dense
    """
    feats = feats_ref[...]                                       # (Bt, N, F)
    bt, n, f = feats.shape

    # Sublane tile of the feats dtype: 8 for f32, 16 for bf16, 32 for 8-bit.
    itemsize = jnp.dtype(feats_ref.dtype).itemsize
    sublane = 8 * max(1, 4 // itemsize)

    # v = feats @ Wv ; accumulate in f32 on the MXU.
    if n % sublane == 0:
        # Free layout view: sublane dims merge cleanly -> one big MXU matmul.
        v = jnp.dot(feats.reshape(bt * n, f), wv_ref[...],
                    preferred_element_type=jnp.float32)          # (Bt*N, A)
        v = v.reshape(bt, n, v.shape[-1])                        # (Bt, N, A)
    else:
        # Avoid a Mosaic relayout copy when N doesn't merge with the batch dim.
        v = jnp.einsum("bnf,fa->bna", feats, wv_ref[...],
                       preferred_element_type=jnp.float32)       # (Bt, N, A)

    # tanh(wh(key) + wv(feats)) ; key projection + both biases precomputed.
    t = jnp.tanh(v + hb_ref[...])                                # (Bt, N, A)

    # scores = wa(t): width-1 matmul done as VPU multiply + lane reduce.
    scores = jnp.sum(t * wa_ref[...], axis=-1)                   # (Bt, N)

    # greedy_select_topk per row: hard {0,1} mask at the top-k positions,
    # lowest-index-first tie breaking (matches lax.top_k convention).
    col_idx = lax.broadcasted_iota(jnp.int32, scores.shape, 1)   # (Bt, N)
    alpha = jnp.zeros_like(scores)
    s = scores
    for _ in range(topk):              # topk is a small static int -> unrolled
        m = jnp.max(s, axis=-1, keepdims=True)                   # (Bt, 1)
        cand = jnp.where(s == m, col_idx, n)
        pos = jnp.min(cand, axis=-1, keepdims=True)              # (Bt, 1)
        sel = col_idx == pos
        alpha = jnp.where(sel, 1.0, alpha)
        s = jnp.where(sel, -jnp.inf, s)

    # att_feats[b] = alpha[b] @ feats[b] as a VPU multiply + sublane reduce
    # (a (1,N)x(N,F) MXU matmul per row would waste 255/256 MXU rows).
    att = jnp.sum(feats.astype(jnp.float32) * alpha[:, :, None], axis=1)

    att_ref[...] = att.astype(att_ref.dtype)                     # (Bt, F)
    alpha_ref[...] = alpha                                       # (Bt, N)


def _vmem_budget_bytes():
    """~75% of the physical per-core VMEM; conservative 48 MiB fallback."""
    cap = 64 * 1024 * 1024            # v7x per-TC VMEM (smallest generation)
    try:
        cap = int(pltpu.get_tpu_info().vmem_capacity_bytes)
    except Exception:
        pass
    return min(int(cap * 0.75), cap - (16 << 20))


def _select_batch_tile(B, N, F, A, feat_bytes, vmem_budget):
    """Largest batch tile whose double-buffered working set fits the budget."""
    weights = 2 * (F * A + A) * 4                  # wv + wa blocks (2x buffered)
    per_bt = (2 * N * F * feat_bytes               # feats tile (2x buffered)
              + 2 * A * 4                          # hb tile
              + 2 * (F + N) * 4                    # att / alpha output tiles
              + 4 * N * A * 4                      # v / tanh / score temporaries
              + N * F * 4                          # f32 product for the reduce
              + 4 * N * 4)                         # top-k (Bt, N) temporaries
    bt_budget = max(1, (vmem_budget - weights) // per_bt)
    cap = max(1, -(-B // 2))           # keep >= 2 grid steps for v7x megacore
    bt = int(min(bt_budget, cap, B))
    # Block rule for the 2-D outputs (bt, F) / (bt, N): the sublane dim must be
    # a multiple of 8 or equal the full batch dim.
    if bt >= 8:
        bt = (bt // 8) * 8
    elif B <= 8:
        bt = B
    else:
        bt = 8
    return bt


def gumbel_topk_attention(feats, key, params, topk):
    """feats: (B, N, F), key: (B, H) -> (att_feats (B, F) f32, alpha (B, N) f32).

    feats may be f32 or bf16; it is streamed in its native dtype (no wrapper
    cast / pad copies).
    """
    B, N, F = feats.shape
    A = params["wh_w"].shape[0]
    assert topk <= N, "topk must not exceed feat_num"

    # Hoist the tiny, batch-only key projection out of the kernel and fold in
    # both linear biases, so the kernel body is matmul + tanh + score + top-k.
    hb = (key.astype(jnp.float32) @ params["wh_w"].T.astype(jnp.float32)
          + params["wh_b"].astype(jnp.float32)
          + params["wv_b"].astype(jnp.float32))                      # (B, A)
    hb3 = hb.reshape(B, 1, A)

    wvT = params["wv_w"].T.astype(jnp.float32)                       # (F, A)
    wa3 = params["wa_w"].reshape(1, 1, A).astype(jnp.float32)        # (1, 1, A)

    feat_bytes = jnp.dtype(feats.dtype).itemsize
    vmem_budget = _vmem_budget_bytes()
    bt = _select_batch_tile(B, N, F, A, feat_bytes, vmem_budget)
    grid = (pl.cdiv(B, bt),)           # ragged last tile: OOB writes dropped

    kernel = functools.partial(_gumbel_topk_attn_kernel, topk=topk)

    att, alpha = pl.pallas_call(
        kernel,
        out_shape=(jax.ShapeDtypeStruct((B, F), jnp.float32),
                   jax.ShapeDtypeStruct((B, N), jnp.float32)),
        grid_spec=pltpu.PrefetchScalarGridSpec(
            num_scalar_prefetch=0,
            grid=grid,
            in_specs=[
                pl.BlockSpec((bt, N, F), lambda b: (b, 0, 0)),
                pl.BlockSpec((bt, 1, A), lambda b: (b, 0, 0)),
                pl.BlockSpec((F, A), lambda b: (0, 0)),
                pl.BlockSpec((1, 1, A), lambda b: (0, 0, 0)),
            ],
            out_specs=[
                pl.BlockSpec((bt, F), lambda b: (b, 0)),   # lane-dense
                pl.BlockSpec((bt, N), lambda b: (b, 0)),   # lane-dense
            ],
        ),
        compiler_params=pltpu.CompilerParams(
            dimension_semantics=("parallel",),      # megacore-shards on v7x
            vmem_limit_bytes=int(vmem_budget),
        ),
    )(feats, hb3, wvT, wa3)

    return att, alpha


def reference(feats, key, params, topk):
    """Pure-JAX reference of the eval-mode forward pass."""
    v = feats @ params["wv_w"].T + params["wv_b"]
    h = key @ params["wh_w"].T + params["wh_b"]
    outputs = jnp.squeeze(jnp.tanh(h[:, None, :] + v) @ params["wa_w"].T, -1)  # (B, N)
    _, idx = lax.top_k(outputs, topk)
    alpha = jnp.zeros_like(outputs).at[
        jnp.arange(outputs.shape[0])[:, None], idx].set(1.0)
    att = jnp.einsum("bn,bnf->bf", alpha, feats)
    return att, alpha


def init_params(key, feat_size, hidden_size, att_size):
    k1, k2, k3, k4, k5 = jax.random.split(key, 5)
    scale = 0.1
    return {
        "wh_w": scale * jax.random.normal(k1, (att_size, hidden_size), jnp.float32),
        "wh_b": scale * jax.random.normal(k2, (att_size,), jnp.float32),
        "wv_w": scale * jax.random.normal(k3, (att_size, feat_size), jnp.float32),
        "wv_b": scale * jax.random.normal(k4, (att_size,), jnp.float32),
        "wa_w": scale * jax.random.normal(k5, (1, att_size), jnp.float32),
    }


if __name__ == "__main__":
    B, N, F, H, A = 2, 16, 32, 32, 32   # batch, feat_num, feat_size, hidden, att_size
    TOPK = 4

    root = jax.random.PRNGKey(0)
    kp, kf, kk = jax.random.split(root, 3)
    params = init_params(kp, F, H, A)
    feats = jax.random.normal(kf, (B, N, F), jnp.float32)
    key = jax.random.normal(kk, (B, H), jnp.float32)

    att_feats, alpha = gumbel_topk_attention(feats, key, params, TOPK)
    jax.block_until_ready((att_feats, alpha))

    att_ref, alpha_ref = reference(feats, key, params, TOPK)
    assert att_feats.shape == (B, F) and alpha.shape == (B, N)
    assert jnp.allclose(alpha, alpha_ref), "alpha mismatch vs reference"
    assert jnp.allclose(att_feats, att_ref, atol=1e-5, rtol=1e-5), "att_feats mismatch"

    print("KERNEL_OK")
</pallas_src>

<mosaic_0001>
module attributes {stable_mosaic.version = 11 : i64} {
  func.func @_gumbel_topk_attn_kernel(%arg0: i32, %arg1: memref<2x16x32xf32, #tpu.memory_space<vmem>>, %arg2: memref<2x1x32xf32, #tpu.memory_space<vmem>>, %arg3: memref<32x32xf32, #tpu.memory_space<vmem>>, %arg4: memref<1x1x32xf32, #tpu.memory_space<vmem>>, %arg5: memref<2x32xf32, #tpu.memory_space<vmem>>, %arg6: memref<2x16xf32, #tpu.memory_space<vmem>>) attributes {dimension_semantics = [#tpu.dimension_semantics<parallel>], iteration_bounds = array<i64: 1>, scalar_prefetch = 0 : i64, scratch_operands = 0 : i64, tpu.core_type = #tpu.core_type<tc>, window_params = [{transform_indices = @transform_0, window_bounds = array<i64: 2, 16, 32>}, {transform_indices = @transform_1, window_bounds = array<i64: 2, 1, 32>}, {pipeline_mode = #tpu.pipeline_mode<synchronous>, transform_indices = @transform_2, window_bounds = array<i64: 32, 32>}, {pipeline_mode = #tpu.pipeline_mode<synchronous>, transform_indices = @transform_3, window_bounds = array<i64: 1, 1, 32>}, {transform_indices = @transform_4, window_bounds = array<i64: 2, 32>}, {transform_indices = @transform_5, window_bounds = array<i64: 2, 16>}]} {
    %c0 = arith.constant 0 : index
    %c0_0 = arith.constant 0 : index
    %c0_1 = arith.constant 0 : index
    %0 = vector.load %arg1[%c0, %c0_0, %c0_1] : memref<2x16x32xf32, #tpu.memory_space<vmem>>, vector<2x16x32xf32>
    %1 = vector.shape_cast %0 : vector<2x16x32xf32> to vector<32x32xf32>
    %c0_2 = arith.constant 0 : index
    %c0_3 = arith.constant 0 : index
    %2 = vector.load %arg3[%c0_2, %c0_3] : memref<32x32xf32, #tpu.memory_space<vmem>>, vector<32x32xf32>
    %cst = arith.constant dense<0.000000e+00> : vector<32x32xf32>
    %3 = tpu.matmul %1, %2, %cst {dimension_numbers = #tpu.dot_dimension_numbers<[1], [0], [0], [1], [0, 0, 1, 1], [], []>} : vector<32x32xf32>, vector<32x32xf32>, vector<32x32xf32> -> vector<32x32xf32>
    %4 = vector.shape_cast %3 : vector<32x32xf32> to vector<2x16x32xf32>
    %c0_4 = arith.constant 0 : index
    %c0_5 = arith.constant 0 : index
    %c0_6 = arith.constant 0 : index
    %5 = vector.load %arg2[%c0_4, %c0_5, %c0_6] : memref<2x1x32xf32, #tpu.memory_space<vmem>>, vector<2x1x32xf32>
    %6 = vector.broadcast %5 : vector<2x1x32xf32> to vector<2x16x32xf32>
    %7 = arith.addf %4, %6 : vector<2x16x32xf32>
    %8 = math.tanh %7 : vector<2x16x32xf32>
    %c0_7 = arith.constant 0 : index
    %c0_8 = arith.constant 0 : index
    %c0_9 = arith.constant 0 : index
    %9 = vector.load %arg4[%c0_7, %c0_8, %c0_9] : memref<1x1x32xf32, #tpu.memory_space<vmem>>, vector<1x1x32xf32>
    %10 = vector.broadcast %9 : vector<1x1x32xf32> to vector<2x16x32xf32>
    %11 = arith.mulf %8, %10 : vector<2x16x32xf32>
    %cst_10 = arith.constant dense<0.000000e+00> : vector<2x16xf32>
    %12 = vector.multi_reduction <add>, %11, %cst_10 [2] : vector<2x16x32xf32> to vector<2x16xf32>
    %13 = tpu.iota {dimensions = array<i32: 1>} : vector<2x16xi32>
    %cst_11 = arith.constant 0.000000e+00 : f32
    %14 = vector.broadcast %cst_11 : f32 to vector<2x16xf32>
    %cst_12 = arith.constant dense<0xFF800000> : vector<2xf32>
    %15 = vector.multi_reduction <maximumf>, %12, %cst_12 [1] : vector<2x16xf32> to vector<2xf32>
    %16 = vector.shape_cast %15 : vector<2xf32> to vector<2x1xf32>
    %17 = vector.broadcast %16 : vector<2x1xf32> to vector<2x16xf32>
    %18 = arith.cmpf oeq, %12, %17 : vector<2x16xf32>
    %c16_i32 = arith.constant 16 : i32
    %19 = vector.broadcast %c16_i32 : i32 to vector<2x16xi32>
    %20 = arith.select %18, %13, %19 : vector<2x16xi1>, vector<2x16xi32>
    %cst_13 = arith.constant dense<2147483647> : vector<2xi32>
    %21 = vector.multi_reduction <minsi>, %20, %cst_13 [1] : vector<2x16xi32> to vector<2xi32>
    %22 = vector.shape_cast %21 : vector<2xi32> to vector<2x1xi32>
    %23 = vector.broadcast %22 : vector<2x1xi32> to vector<2x16xi32>
    %24 = arith.cmpi eq, %13, %23 : vector<2x16xi32>
    %cst_14 = arith.constant 1.000000e+00 : f32
    %25 = vector.broadcast %cst_14 : f32 to vector<2x16xf32>
    %26 = arith.select %24, %25, %14 : vector<2x16xi1>, vector<2x16xf32>
    %cst_15 = arith.constant 0xFF800000 : f32
    %27 = vector.broadcast %cst_15 : f32 to vector<2x16xf32>
    %28 = arith.select %24, %27, %12 : vector<2x16xi1>, vector<2x16xf32>
    %cst_16 = arith.constant dense<0xFF800000> : vector<2xf32>
    %29 = vector.multi_reduction <maximumf>, %28, %cst_16 [1] : vector<2x16xf32> to vector<2xf32>
    %30 = vector.shape_cast %29 : vector<2xf32> to vector<2x1xf32>
    %31 = vector.broadcast %30 : vector<2x1xf32> to vector<2x16xf32>
    %32 = arith.cmpf oeq, %28, %31 : vector<2x16xf32>
    %c16_i32_17 = arith.constant 16 : i32
    %33 = vector.broadcast %c16_i32_17 : i32 to vector<2x16xi32>
    %34 = arith.select %32, %13, %33 : vector<2x16xi1>, vector<2x16xi32>
    %cst_18 = arith.constant dense<2147483647> : vector<2xi32>
    %35 = vector.multi_reduction <minsi>, %34, %cst_18 [1] : vector<2x16xi32> to vector<2xi32>
    %36 = vector.shape_cast %35 : vector<2xi32> to vector<2x1xi32>
    %37 = vector.broadcast %36 : vector<2x1xi32> to vector<2x16xi32>
    %38 = arith.cmpi eq, %13, %37 : vector<2x16xi32>
    %cst_19 = arith.constant 1.000000e+00 : f32
    %39 = vector.broadcast %cst_19 : f32 to vector<2x16xf32>
    %40 = arith.select %38, %39, %26 : vector<2x16xi1>, vector<2x16xf32>
    %cst_20 = arith.constant 0xFF800000 : f32
    %41 = vector.broadcast %cst_20 : f32 to vector<2x16xf32>
    %42 = arith.select %38, %41, %28 : vector<2x16xi1>, vector<2x16xf32>
    %cst_21 = arith.constant dense<0xFF800000> : vector<2xf32>
    %43 = vector.multi_reduction <maximumf>, %42, %cst_21 [1] : vector<2x16xf32> to vector<2xf32>
    %44 = vector.shape_cast %43 : vector<2xf32> to vector<2x1xf32>
    %45 = vector.broadcast %44 : vector<2x1xf32> to vector<2x16xf32>
    %46 = arith.cmpf oeq, %42, %45 : vector<2x16xf32>
    %c16_i32_22 = arith.constant 16 : i32
    %47 = vector.broadcast %c16_i32_22 : i32 to vector<2x16xi32>
    %48 = arith.select %46, %13, %47 : vector<2x16xi1>, vector<2x16xi32>
    %cst_23 = arith.constant dense<2147483647> : vector<2xi32>
    %49 = vector.multi_reduction <minsi>, %48, %cst_23 [1] : vector<2x16xi32> to vector<2xi32>
    %50 = vector.shape_cast %49 : vector<2xi32> to vector<2x1xi32>
    %51 = vector.broadcast %50 : vector<2x1xi32> to vector<2x16xi32>
    %52 = arith.cmpi eq, %13, %51 : vector<2x16xi32>
    %cst_24 = arith.constant 1.000000e+00 : f32
    %53 = vector.broadcast %cst_24 : f32 to vector<2x16xf32>
    %54 = arith.select %52, %53, %40 : vector<2x16xi1>, vector<2x16xf32>
    %cst_25 = arith.constant 0xFF800000 : f32
    %55 = vector.broadcast %cst_25 : f32 to vector<2x16xf32>
    %56 = arith.select %52, %55, %42 : vector<2x16xi1>, vector<2x16xf32>
    %cst_26 = arith.constant dense<0xFF800000> : vector<2xf32>
    %57 = vector.multi_reduction <maximumf>, %56, %cst_26 [1] : vector<2x16xf32> to vector<2xf32>
    %58 = vector.shape_cast %57 : vector<2xf32> to vector<2x1xf32>
    %59 = vector.broadcast %58 : vector<2x1xf32> to vector<2x16xf32>
    %60 = arith.cmpf oeq, %56, %59 : vector<2x16xf32>
    %c16_i32_27 = arith.constant 16 : i32
    %61 = vector.broadcast %c16_i32_27 : i32 to vector<2x16xi32>
    %62 = arith.select %60, %13, %61 : vector<2x16xi1>, vector<2x16xi32>
    %cst_28 = arith.constant dense<2147483647> : vector<2xi32>
    %63 = vector.multi_reduction <minsi>, %62, %cst_28 [1] : vector<2x16xi32> to vector<2xi32>
    %64 = vector.shape_cast %63 : vector<2xi32> to vector<2x1xi32>
    %65 = vector.broadcast %64 : vector<2x1xi32> to vector<2x16xi32>
    %66 = arith.cmpi eq, %13, %65 : vector<2x16xi32>
    %cst_29 = arith.constant 1.000000e+00 : f32
    %67 = vector.broadcast %cst_29 : f32 to vector<2x16xf32>
    %68 = arith.select %66, %67, %54 : vector<2x16xi1>, vector<2x16xf32>
    %69 = vector.shape_cast %68 : vector<2x16xf32> to vector<2x16x1xf32>
    %70 = vector.broadcast %69 : vector<2x16x1xf32> to vector<2x16x32xf32>
    %71 = arith.mulf %0, %70 : vector<2x16x32xf32>
    %cst_30 = arith.constant dense<0.000000e+00> : vector<2x32xf32>
    %72 = vector.multi_reduction <add>, %71, %cst_30 [1] : vector<2x16x32xf32> to vector<2x32xf32>
    %c0_31 = arith.constant 0 : index
    %c0_32 = arith.constant 0 : index
    %73 = vector.load %arg5[%c0_31, %c0_32] : memref<2x32xf32, #tpu.memory_space<vmem>>, vector<2x32xf32>
    tpu.vector_store %arg5[%c0_31, %c0_32], %72 {strides = array<i32>} : memref<2x32xf32, #tpu.memory_space<vmem>>, vector<2x32xf32>,
    %c0_33 = arith.constant 0 : index
    %c0_34 = arith.constant 0 : index
    %74 = vector.load %arg6[%c0_33, %c0_34] : memref<2x16xf32, #tpu.memory_space<vmem>>, vector<2x16xf32>
    tpu.vector_store %arg6[%c0_33, %c0_34], %68 {strides = array<i32>} : memref<2x16xf32, #tpu.memory_space<vmem>>, vector<2x16xf32>,
    return
  }
  func.func @transform_0(%arg0: i32) -> (i32, i32, i32) {
    %c0_i32 = arith.constant 0 : i32
    %c0_i32_0 = arith.constant 0 : i32
    %c0_i32_1 = arith.constant 0 : i32
    return %arg0, %c0_i32, %c0_i32_0 : i32, i32, i32
  }
  func.func @transform_1(%arg0: i32) -> (i32, i32, i32) {
    %c0_i32 = arith.constant 0 : i32
    %c0_i32_0 = arith.constant 0 : i32
    %c0_i32_1 = arith.constant 0 : i32
    return %arg0, %c0_i32, %c0_i32_0 : i32, i32, i32
  }
  func.func @transform_2(%arg0: i32) -> (i32, i32) {
    %c0_i32 = arith.constant 0 : i32
    %c0_i32_0 = arith.constant 0 : i32
    %c0_i32_1 = arith.constant 0 : i32
    return %c0_i32, %c0_i32_0 : i32, i32
  }
  func.func @transform_3(%arg0: i32) -> (i32, i32, i32) {
    %c0_i32 = arith.constant 0 : i32
    %c0_i32_0 = arith.constant 0 : i32
    %c0_i32_1 = arith.constant 0 : i32
    %c0_i32_2 = arith.constant 0 : i32
    return %c0_i32, %c0_i32_0, %c0_i32_1 : i32, i32, i32
  }
  func.func @transform_4(%arg0: i32) -> (i32, i32) {
    %c0_i32 = arith.constant 0 : i32
    %c0_i32_0 = arith.constant 0 : i32
    return %arg0, %c0_i32 : i32, i32
  }
  func.func @transform_5(%arg0: i32) -> (i32, i32) {
    %c0_i32 = arith.constant 0 : i32
    %c0_i32_0 = arith.constant 0 : i32
    return %arg0, %c0_i32 : i32, i32
  }
}

</mosaic_0001>

<bundles_post_ra>
// kernel: tpu_custom_call.1
= control target key start
LH: loop header
LB: loop body
LE: loop exit
PB: predicated region body
PF: predicated region fallthrough
CT: control target
= control target key end

     0   :  { %11 = vsyncpa [#allocation3], 0  ;;  %s703_s0 = inlined_call_operand.hbm [shape: f32[2,16,32], index: 0, kind: input, shape index: {}]   ;;  %s704_s1 = inlined_call_operand.hbm [shape: f32[2,1,32], index: 1, kind: input, shape index: {}]   ;;  %s705_s2 = inlined_call_operand.hbm [shape: f32[32,32], index: 2, kind: input, shape index: {}]   ;;  %s706_s3 = inlined_call_operand.vmem [shape: f32[1,1,32], index: 3, kind: input, shape index: {}]   ;;  %s707_s4 = inlined_call_operand.hbm [shape: f32[2,32], index: 4, kind: output, shape index: {0}]   ;;  %s708_s5 = inlined_call_operand.hbm [shape: f32[2,16], index: 5, kind: output, shape index: {1}]  }
   0x1   :  { %12 = vsyncpa [#allocation6], 0 }
   0x2   :  { %13 = vsyncpa [#allocation4], 0  ;;  %s32_s20 = sshll.u32 %s704_s1, 4  ;;  %s33_s20 = int_to_ptr.hbm [resolvable:$true] %s32_s20 }
   0x3   :  { %14 = vsyncpa [#allocation10], 0  ;;  %s575_s21 = smov [#allocation5]   ;;  %s19_s25 = sshll.u32 %s703_s0, 4  ;;  %s20_s25 = int_to_ptr.hbm [resolvable:$true] %s19_s25 }
   0x4   :  { %s34_s22 = sshll.u32 %s575_s21, 4  ;;  %s576_s26 = smov 16   ;;  %s35_s22 = int_to_ptr.vmem [resolvable:$true] %s34_s22 }
   0x5   :  { %s577_s27 = smov 1   ;;  %s578_s28 = smov [#allocation2]  }
   0x6   :  { %40 = dma.hbm_to_vmem [thread:$0]  %s33_s20, 32, %s35_s22, [#allocation6], %s576_s26, %s576_s26, %s577_s27  }
   0x7   :  { %s21_s29 = sshll.u32 %s578_s28, 4  ;;  %s579_s30 = smov 128   ;;  %s22_s29 = int_to_ptr.vmem [resolvable:$true] %s21_s29 }
   0x8   :  { %s580_s6 = smov 8   ;;  %s45_s8 = sshll.u32 %s705_s2, 4  ;;  %s46_s8 = int_to_ptr.hbm [resolvable:$true] %s45_s8 }
   0x9   :  { %27 = dma.hbm_to_vmem [thread:$0]  %s20_s25, 512, %s22_s29, [#allocation3], %s579_s30, %s579_s30, %s580_s6  }
   0xa   :  { %s581_s9 = smov [#allocation7]  }
   0xb   :  { %s47_s10 = sshll.u32 %s581_s9, 4  ;;  %s48_s10 = int_to_ptr.vmem [resolvable:$true] %s47_s10 }
   0xc   :  { %53 = dma.hbm_to_vmem [thread:$0]  %s46_s8, 512, %s48_s10, [#allocation6], %s579_s30, %s579_s30, %s580_s6  }
   0xd   :  { %567 = dma.done.wait [#allocation3], 512  }
   0xe   :  { %568 = vsyncadd [#allocation3], 4294966784 }
   0xf   :  { %569 = dma.done.wait [#allocation6], 544  }
  0x10   :  { %570 = vsyncadd [#allocation6], 4294966752  ;;  %v75_v0 = vld [vmem:[#allocation7 + $0x18] sm:$0xff]  ;;  %v74_v1 = vld [vmem:[#allocation7 + $0x10] sm:$0xff]  ;;  %vm76_vm0 = vcmask 261120   ;;  %v154_v8 = vlaneseq  ;;  %vm163_vm1 = vcmask 130112  }
  0x11   :  { %101 = vmatpush.msra.mxu0 %v75_v0  ;;  %399 = vmatpush.msra.mxu2 %v75_v0  ;;  %v73_v2 = vld [vmem:[#allocation7 + $0x8] sm:$0xff]  ;;  %v72_v3 = vld [vmem:[#allocation7] sm:$0xff]  ;;  %v631_v7 = vld [vmem:[#allocation2 + $0x18] sm:$0xff]  ;;  %vm168_vm2 = vcmask 1041409   ;;  %vm171_vm3 = vcmask 123904   ;;  %v582_v48 = vmov 0  }
  0x12   :  { %398 = vmatpush.msra.mxu1 %v75_v0  ;;  %400 = vmatpush.msra.mxu3 %v75_v0  ;;  %v625_v4 = vld [vmem:[#allocation2] sm:$0xff]  ;;  %v627_v5 = vld [vmem:[#allocation2 + $0x10] sm:$0xff]  ;;  %v629_v6 = vld [vmem:[#allocation2 + $0x8] sm:$0xff]  ;;  %v641_v10 = vshrl.u32 %v154_v8, 7  ;;  %v644_v16 = vand.u32 127, %v154_v8  ;;  %s378_s14 = sshll.u32 %s708_s5, 4  ;;  %s379_s14 = int_to_ptr.hbm [resolvable:$true] %s378_s14 }
  0x13   :  { %102 = vmatpush.msra.mxu0 %v74_v1  ;;  %402 = vmatpush.msra.mxu2 %v74_v1  ;;  %v436_v9 = vld [vmem:[#allocation5] ss:$0 sm:$0xff]  ;;  %v437_v14 = vld [vmem:[#allocation5 + $0x1] ss:$0 sm:$0xff]  ;;  %s585_s5 = smov [#allocation8]   ;;  %s367_s18 = sshll.u32 %s707_s4, 4  ;;  %s368_s18 = int_to_ptr.hbm [resolvable:$true] %s367_s18 }
  0x14   :  { %401 = vmatpush.msra.mxu1 %v74_v1  ;;  %403 = vmatpush.msra.mxu3 %v74_v1  ;;  %v438_v18 = vld [vmem:[%s706_s3] ss:$0 sm:$0xff]  ;;  %v192_v34 = vadd.s32 8, %v641_v10  ;;  %v161_v37 = vadd.s32 4294967288, %v644_v16  ;;  %s584_s3 = smov [#allocation9]   ;;  %s365_s15 = sshll.u32 %s585_s5, 4  ;;  %s366_s15 = int_to_ptr.vmem [resolvable:$true] %s365_s15 }
  0x15   :  { %103 = vmatpush.msra.mxu0 %v73_v2  ;;  %405 = vmatpush.msra.mxu2 %v73_v2  ;;  %s376_s11 = sshll.u32 %s584_s3, 4  ;;  %s377_s11 = int_to_ptr.vmem [resolvable:$true] %s376_s11 }
  0x16   :  { %404 = vmatpush.msra.mxu1 %v73_v2  ;;  %406 = vmatpush.msra.mxu3 %v73_v2 }
  0x17   :  { %104 = vmatpush.msra.mxu0 %v72_v3  ;;  %408 = vmatpush.msra.mxu2 %v72_v3 }
  0x18   :  { %394 = vmatmul.msk.f32.vlgmr.msra.gmra.mxu0 %vm76_vm0, %v625_v4  ;;  %396 = vmatmul.msk.f32.vlgmr.msra.gmra.mxu2 %vm76_vm0, %v627_v5 }
  0x19   :  { %407 = vmatpush.msra.mxu1 %v72_v3  ;;  %409 = vmatpush.msra.mxu3 %v72_v3 }
  0x1a   :  { %395 = vmatmul.msk.f32.vlgmr.msra.gmra.mxu1 %vm76_vm0, %v629_v6  ;;  %397 = vmatmul.msk.f32.vlgmr.msra.gmra.mxu3 %vm76_vm0, %v631_v7 }
  0x1b   :  { %421 = vset.pattern.permute.xlu2 %v641_v10  ;;  %422 = vset.pattern.permute.xlu0 %v192_v34 }
  0x1c   :  { %423 = vset.pattern.permute.xlu1 %v582_v48 }
  0x23   :  { %188 = vperm.xlu2 %421, %v644_v16  }
  0x2b   :  { %424 = vset.pattern.permute.xlu2 %v582_v48 }
  0x7d   :  { %v189_v49 = vpop.permute.xlu2 %188 }
  0x95   :  { %v106_v11 = vpop.f32.mrf.mxu0 }
  0x96   :  { %v126_v12 = vadd.f32 %v436_v9, %v106_v11 }
  0x97   :  { %v109_v13 = vpop.f32.mrf.mxu1 }
  0x98   :  { %439 = vtanh.f32 %v126_v12  ;;  %v127_v15 = vadd.f32 %v436_v9, %v109_v13 }
  0x9a   :  { %441 = vtanh.f32 %v127_v15 }
  0x9b   :  { %v112_v17 = vpop.f32.mrf.mxu2 }
  0x9c   :  { %v128_v19 = vadd.f32 %v437_v14, %v112_v17 }
  0x9d   :  { %v115_v20 = vpop.f32.mrf.mxu3 }
  0x9e   :  { %v440_v21 = vpop.eup %439  ;;  %443 = vtanh.f32 %v128_v19  ;;  %v129_v22 = vadd.f32 %v437_v14, %v115_v20 }
  0x9f   :  { %v138_v23 = vmul.f32 %v440_v21, %v438_v18 }
  0xa0   :  { %v442_v24 = vpop.eup %441  ;;  %445 = vtanh.f32 %v129_v22 }
  0xa1   :  { %v142_v25 = vsel %vm76_vm0, %v138_v23, 0.0  ;;  %v139_v26 = vmul.f32 %v442_v24, %v438_v18 }
  0xa2   :  { %143 = vadd.xlane.f32.xlu0 %v142_v25 }
  0xa3   :  { %v145_v31 = vsel %vm76_vm0, %v139_v26, 0.0 }
  0xa4   :  { %v444_v27 = vpop.eup %443 }
  0xa5   :  { %v140_v28 = vmul.f32 %v444_v27, %v438_v18 }
  0xa6   :  { %v446_v29 = vpop.eup %445 }
  0xa7   :  { %v148_v30 = vsel %vm76_vm0, %v140_v28, 0.0  ;;  %v141_v32 = vmul.f32 %v446_v29, %v438_v18 }
  0xa8   :  { %149 = vadd.xlane.f32.xlu1 %v148_v30 }
  0xa9   :  { %v151_v33 = vsel %vm76_vm0, %v141_v32, 0.0 }
  0xaa   :  { %146 = vadd.xlane.f32.xlu0 %v145_v31 }
  0xb0   :  { %152 = vadd.xlane.f32.xlu1 %v151_v33 }
  0xbe   :  { %194 = vperm.xlu0 %422, %v644_v16  }
 0x115   :  { %v144_v35 = vpop.xlane.xlu0 %143 }
 0x116   :  { %v160_v41 = vperm.slane %v144_v35, %v644_v16 }
 0x11b   :  { %v150_v36 = vpop.xlane.xlu1 %149 }
 0x11c   :  { %v165_v42 = vperm.slane %v150_v36, %v644_v16 }
 0x11d   :  { %v147_v38 = vpop.xlane.xlu0 %146 }
 0x11e   :  { %v162_v39 = vperm.slane %v147_v38, %v161_v37 }
 0x120   :  { %v164_v44 = vsel %vm163_vm1, %v162_v39, %v160_v41 }
 0x123   :  { %v153_v40 = vpop.xlane.xlu1 %152 }
 0x124   :  { %v166_v43 = vperm.slane %v153_v40, %v161_v37 }
 0x126   :  { %v167_v45 = vsel %vm163_vm1, %v166_v43, %v165_v42 }
 0x127   :  { %v169_v46 = vsel %vm168_vm2, %v167_v45, %v164_v44 }
 0x128   :  { %v172_v47 = vsel %vm171_vm3, %v169_v46, -inf }
 0x129   :  { %173 = vmax.xlane.f32.xlu2 %v172_v47 }
 0x130   :  { %v195_v52 = vpop.permute.xlu0 %194 }
 0x19c   :  { %v174_v50 = vpop.xlane.xlu2 %173 }
 0x19d   :  { %v176_v51 = vperm.slane %v174_v50, 0  ;;  %v177_v55 = vperm.slane %v174_v50, 1 }
 0x19f   :  { %vm180_vm4 = vcmp.eq.f32.partialorder %v144_v35, %v176_v51  ;;  %vm181_vm5 = vcmp.eq.f32.partialorder %v147_v38, %v176_v51  ;;  %vm183_vm6 = vcmp.eq.f32.partialorder %v153_v40, %v177_v55  ;;  %vm182_vm7 = vcmp.eq.f32.partialorder %v150_v36, %v177_v55 }
 0x1a0   :  { %v196_v53 = vsel %vm180_vm4, %v189_v49, 16  ;;  %v197_v54 = vsel %vm181_vm5, %v195_v52, 16  ;;  %v199_v56 = vsel %vm183_vm6, %v195_v52, 16  ;;  %v198_v57 = vsel %vm182_vm7, %v189_v49, 16 }
 0x1a1   :  { %201 = vperm.xlu1 %423, %v196_v53   ;;  %204 = vperm.xlu2 %424, %v197_v54   ;;  %v583_v38 = vmov 0.0  }
 0x1a9   :  { %210 = vperm.xlu1 %423, %v199_v56   ;;  %207 = vperm.xlu2 %424, %v198_v57  }
 0x1b1   :  { %425 = vset.pattern.permute.xlu2 %v641_v10 }
 0x1fb   :  { %v205_v58 = vpop.permute.xlu2 %204 }
 0x1fc   :  { %v213_v63 = vperm.slane %v205_v58, %v161_v37 }
 0x203   :  { %v208_v60 = vpop.permute.xlu2 %207 }
 0x204   :  { %v215_v0 = vperm.slane %v208_v60, %v644_v16 }
 0x213   :  { %v202_v59 = vpop.permute.xlu1 %201 }
 0x214   :  { %v212_v61 = vperm.slane %v202_v59, %v644_v16 }
 0x216   :  { %v214_v2 = vsel %vm163_vm1, %v213_v63, %v212_v61 }
 0x21b   :  { %v211_v62 = vpop.permute.xlu1 %210 }
 0x21c   :  { %v216_v1 = vperm.slane %v211_v62, %v161_v37 }
 0x21e   :  { %v217_v3 = vsel %vm163_vm1, %v216_v1, %v215_v0 }
 0x21f   :  { %v218_v8 = vsel %vm168_vm2, %v217_v3, %v214_v2 }
 0x220   :  { %v219_v9 = vsel %vm171_vm3, %v218_v8, 2147483647 }
 0x221   :  { %v221_v11 = vshra.s32 %v219_v9, 16  ;;  %v220_v12 = vand.u32 65535, %v219_v9 }
 0x223   :  { %v223_v10 = vcvt.s32.f32 %v221_v11  ;;  %v222_v14 = vcvt.s32.f32 %v220_v12 }
 0x225   :  { %224 = vmin.xlane.f32.xlu2 %v223_v10 }
 0x298   :  { %v225_v13 = vpop.xlane.xlu2 %224 }
 0x299   :  { %vm226_vm8 = vcmp.eq.f32.partialorder %v223_v10, %v225_v13  ;;  %v231_v17 = vcvt.f32.s32 %v225_v13 }
 0x29a   :  { %v227_v15 = vsel %vm226_vm8, %v222_v14, inf }
 0x29b   :  { %228 = vmin.xlane.f32.xlu1 %v227_v15  ;;  %v232_v19 = vshll.u32 %v231_v17, 16 }
 0x30e   :  { %v229_v18 = vpop.xlane.xlu1 %228 }
 0x30f   :  { %v230_v20 = vcvt.f32.s32 %v229_v18 }
 0x311   :  { %v233_v21 = vadd.s32 %v232_v19, %v230_v20 }
 0x313   :  { %vm234_vm9 = vcmp.eq.s32.totalorder %v644_v16, %v233_v21 }
 0x314   :  { %v236_v22 = vsel %vm234_vm9, -inf, %v169_v46  ;;  %v235_v39 = vsel %vm234_vm9, 1.0, %v583_v38 }
 0x315   :  { %v237_v23 = vsel %vm171_vm3, %v236_v22, -inf }
 0x316   :  { %238 = vmax.xlane.f32.xlu0 %v237_v23 }
 0x389   :  { %v239_v24 = vpop.xlane.xlu0 %238 }
 0x38a   :  { %vm240_vm10 = vcmp.eq.f32.partialorder %v236_v22, %v239_v24 }
 0x38b   :  { %v241_v25 = vsel %vm240_vm10, %v644_v16, 16 }
 0x38c   :  { %v242_v26 = vsel %vm171_vm3, %v241_v25, 2147483647 }
 0x38d   :  { %v244_v27 = vshra.s32 %v242_v26, 16  ;;  %v243_v29 = vand.u32 65535, %v242_v26 }
 0x38f   :  { %v246_v28 = vcvt.s32.f32 %v244_v27  ;;  %v245_v31 = vcvt.s32.f32 %v243_v29 }
 0x391   :  { %247 = vmin.xlane.f32.xlu2 %v246_v28 }
 0x404   :  { %v248_v30 = vpop.xlane.xlu2 %247 }
 0x405   :  { %vm249_vm11 = vcmp.eq.f32.partialorder %v246_v28, %v248_v30  ;;  %v254_v33 = vcvt.f32.s32 %v248_v30 }
 0x406   :  { %v250_v32 = vsel %vm249_vm11, %v245_v31, inf }
 0x407   :  { %251 = vmin.xlane.f32.xlu1 %v250_v32  ;;  %v255_v35 = vshll.u32 %v254_v33, 16 }
 0x47a   :  { %v252_v34 = vpop.xlane.xlu1 %251 }
 0x47b   :  { %v253_v36 = vcvt.f32.s32 %v252_v34 }
 0x47d   :  { %v256_v37 = vadd.s32 %v255_v35, %v253_v36 }
 0x47f   :  { %vm257_vm12 = vcmp.eq.s32.totalorder %v644_v16, %v256_v37 }
 0x480   :  { %v259_v40 = vsel %vm257_vm12, -inf, %v236_v22  ;;  %v258_v41 = vsel %vm257_vm12, 1.0, %v235_v39 }
 0x481   :  { %v260_v42 = vsel %vm171_vm3, %v259_v40, -inf }
 0x482   :  { %261 = vmax.xlane.f32.xlu2 %v260_v42 }
 0x4f5   :  { %v262_v43 = vpop.xlane.xlu2 %261 }
 0x4f6   :  { %vm263_vm13 = vcmp.eq.f32.partialorder %v259_v40, %v262_v43 }
 0x4f7   :  { %v264_v44 = vsel %vm263_vm13, %v644_v16, 16 }
 0x4f8   :  { %v265_v45 = vsel %vm171_vm3, %v264_v44, 2147483647 }
 0x4f9   :  { %v267_v46 = vshra.s32 %v265_v45, 16  ;;  %v266_v48 = vand.u32 65535, %v265_v45 }
 0x4fb   :  { %v269_v47 = vcvt.s32.f32 %v267_v46  ;;  %v268_v50 = vcvt.s32.f32 %v266_v48 }
 0x4fd   :  { %270 = vmin.xlane.f32.xlu0 %v269_v47 }
 0x570   :  { %v271_v49 = vpop.xlane.xlu0 %270 }
 0x571   :  { %vm272_vm14 = vcmp.eq.f32.partialorder %v269_v47, %v271_v49  ;;  %v277_v52 = vcvt.f32.s32 %v271_v49 }
 0x572   :  { %v273_v51 = vsel %vm272_vm14, %v268_v50, inf }
 0x573   :  { %274 = vmin.xlane.f32.xlu1 %v273_v51  ;;  %v278_v54 = vshll.u32 %v277_v52, 16 }
 0x5e6   :  { %v275_v53 = vpop.xlane.xlu1 %274 }
 0x5e7   :  { %v276_v55 = vcvt.f32.s32 %v275_v53 }
 0x5e9   :  { %v279_v56 = vadd.s32 %v278_v54, %v276_v55 }
 0x5eb   :  { %vm280_vm15 = vcmp.eq.s32.totalorder %v644_v16, %v279_v56 }
 0x5ec   :  { %v282_v57 = vsel %vm280_vm15, -inf, %v259_v40  ;;  %v281_v58 = vsel %vm280_vm15, 1.0, %v258_v41 }
 0x5ed   :  { %v283_v59 = vsel %vm171_vm3, %v282_v57, -inf }
 0x5ee   :  { %284 = vmax.xlane.f32.xlu2 %v283_v59 }
 0x661   :  { %v285_v60 = vpop.xlane.xlu2 %284 }
 0x662   :  { %vm286_vm1 = vcmp.eq.f32.partialorder %v282_v57, %v285_v60 }
 0x663   :  { %v287_v61 = vsel %vm286_vm1, %v644_v16, 16 }
 0x664   :  { %v288_v62 = vsel %vm171_vm3, %v287_v61, 2147483647 }
 0x665   :  { %v290_v63 = vshra.s32 %v288_v62, 16  ;;  %v289_v1 = vand.u32 65535, %v288_v62 }
 0x667   :  { %v292_v0 = vcvt.s32.f32 %v290_v63  ;;  %v291_v3 = vcvt.s32.f32 %v289_v1 }
 0x669   :  { %293 = vmin.xlane.f32.xlu0 %v292_v0 }
 0x6dc   :  { %v294_v2 = vpop.xlane.xlu0 %293 }
 0x6dd   :  { %vm295_vm4 = vcmp.eq.f32.partialorder %v292_v0, %v294_v2  ;;  %v300_v9 = vcvt.f32.s32 %v294_v2 }
 0x6de   :  { %v296_v8 = vsel %vm295_vm4, %v291_v3, inf }
 0x6df   :  { %297 = vmin.xlane.f32.xlu1 %v296_v8  ;;  %v301_v10 = vshll.u32 %v300_v9, 16 }
 0x752   :  { %v298_v11 = vpop.xlane.xlu1 %297 }
 0x753   :  { %v299_v12 = vcvt.f32.s32 %v298_v11 }
 0x755   :  { %v302_v13 = vadd.s32 %v301_v10, %v299_v12 }
 0x757   :  { %vm303_vm5 = vcmp.eq.s32.totalorder %v644_v16, %v302_v13 }
 0x758   :  { %v304_v14 = vsel %vm303_vm5, 1.0, %v281_v58 }
 0x759   :  { %359 = vst.msk [vmem:[#allocation9] sm:$0x3] %vm171_vm3, %v304_v14  ;;  %v305_v15 = vperm.slane %v304_v14, 0  ;;  %v318_v17 = vperm.slane %v304_v14, 1 }
 0x75a   :  { %381 = dma.vmem_to_hbm [thread:$0]  %s377_s11, 32, %s379_s14, [#allocation10]  }
 0x75b   :  { %v431_v18 = vpack.i.bf16 %v318_v17, %v305_v15 }
 0x75d   :  { %432 = vperm.xlu0 %422, %v431_v18   ;;  %427 = vperm.xlu2 %425, %v431_v18  }
 0x7b7   :  { %v428_v19 = vpop.permute.xlu2 %427 }
 0x7b8   :  { %v430_v20 = vunpack.i.h.bf16 %v428_v19  ;;  %v429_v16 = vunpack.i.l.bf16 %v428_v19 }
 0x7ba   :  { %v333_v22 = vmul.f32 %v430_v20, %v627_v5  ;;  %v331_v23 = vmul.f32 %v429_v16, %v625_v4 }
 0x7bc   :  { %v344_v28 = vsel %vm76_vm0, %v333_v22, 0.0  ;;  %v335_v29 = vsel %vm76_vm0, %v331_v23, 0.0 }
 0x7cf   :  { %v433_v21 = vpop.permute.xlu0 %432 }
 0x7d0   :  { %v435_v24 = vunpack.i.h.bf16 %v433_v21  ;;  %v434_v25 = vunpack.i.l.bf16 %v433_v21 }
 0x7d2   :  { %v334_v26 = vmul.f32 %v435_v24, %v631_v7  ;;  %v332_v27 = vmul.f32 %v434_v25, %v629_v6 }
 0x7d4   :  { %v345_v30 = vsel %vm76_vm0, %v334_v26, 0.0  ;;  %v336_v31 = vsel %vm76_vm0, %v332_v27, 0.0  ;;  %vm357_vm0 = vcmask 254976  }
 0x7d5   :  { %v337_v32 = vadd.f32 %v336_v31, %v335_v29  ;;  %v346_v33 = vadd.f32 %v345_v30, %v344_v28 }
 0x7d7   :  { %v338_v34 = vrot.slane %v337_v32, 4  ;;  %v347_v5 = vrot.slane %v346_v33, 4 }
 0x7d9   :  { %v339_v35 = vadd.f32 %v338_v34, %v337_v32  ;;  %v348_v4 = vadd.f32 %v347_v5, %v346_v33 }
 0x7db   :  { %v340_v36 = vrot.slane %v339_v35, 2  ;;  %v349_v37 = vrot.slane %v348_v4, 2 }
 0x7dd   :  { %v341_v38 = vadd.f32 %v340_v36, %v339_v35  ;;  %v350_v7 = vadd.f32 %v349_v37, %v348_v4 }
 0x7df   :  { %v342_v39 = vrot.slane %v341_v38, 1  ;;  %v351_v6 = vrot.slane %v350_v7, 1 }
 0x7e1   :  { %v343_v40 = vadd.f32 %v342_v39, %v341_v38  ;;  %v352_v41 = vadd.f32 %v351_v6, %v350_v7 }
 0x7e3   :  { %v355_v42 = vsel %vm168_vm2, %v352_v41, %v343_v40 }
 0x7e4   :  { %358 = vst.msk [vmem:[#allocation8] sm:$0x3] %vm357_vm0, %v355_v42 }
 0x7e5   :  { %370 = dma.vmem_to_hbm [thread:$0]  %s366_s15, 32, %s368_s18, [#allocation4]  }
 0x7e6   :  { %571 = dma.done.wait [#allocation4], 32  }
 0x7e7   :  { %572 = vsyncadd [#allocation4], 4294967264 }
 0x7e8   :  { %573 = dma.done.wait [#allocation10], 32  }
 0x7e9   :  { %574 = vsyncadd [#allocation10], 4294967264 }
 0x7ea   :  { %390 = vsyncpa [#allocation3], 1 }
 0x7eb   :  { %391 = vsyncpa [#allocation6], 1 }
 0x7ec   :  { %392 = vsyncpa [#allocation4], 1 }
 0x7ed   :  { %393 = vsyncpa [#allocation10], 1 }

</bundles_post_ra>
